<compile_context>
chip_gen: v7x
topology: tpu7x:2x2x1
jax: 0.10.0
libtpu: 0.0.40
codegen_flags: <defaults>
</compile_context>

<pallas_src>
import functools

import jax
import jax.numpy as jnp
import numpy as np
from jax import lax
from jax.experimental import pallas as pl
from jax.experimental.pallas import tpu as pltpu

LATENT = 32                       # input feature dim of the linear layer
H = W = 24                        # spatial size after reshape (-1, 1, 24, 24)
C_HID = 8                         # hidden channels of the (assumed) decoder
B = 2                             # demo batch size
HW = H * W                        # 576
FLAT = ((HW + 127) // 128) * 128  # 640: lane-dense flat width (multiple of 128)
N_TAPS = 9                        # 3x3 stencil


# ----------------------------------------------------------------------------
# Static tap geometry: flat-index offsets + validity masks for a 3x3 "same"
# convolution on a row-major 24x24 image embedded in a 640-wide lane vector.
# Tap order k = ki*3 + kj (PyTorch weight order), with (di, dj) = (ki-1, kj-1).
# ----------------------------------------------------------------------------
def _tap_offsets_and_masks():
    p = np.arange(FLAT)
    rr, cc = p // W, p % W
    deltas, masks = [], []
    for di in (-1, 0, 1):
        for dj in (-1, 0, 1):
            valid = ((p < HW)
                     & (rr + di >= 0) & (rr + di < H)
                     & (cc + dj >= 0) & (cc + dj < W))
            deltas.append(di * W + dj)
            masks.append(valid.astype(np.float32))
    return tuple(deltas), np.stack(masks, axis=0)      # (9,), (9, FLAT)


DELTAS, TAP_MASKS = _tap_offsets_and_masks()


def _detect_roll_sign():
    """Tiny one-off probe: determine pltpu.roll's direction convention.

    Returns s such that pltpu.roll(x, (s*d) % n, axis=-1)[..., p] == x[..., p+d]
    (for in-range p+d).  Guards against roll-direction differences across
    jax versions; costs one trivial compile at startup.
    """
    def probe(x_ref, o_ref):
        o_ref[...] = pltpu.roll(x_ref[...], 1, 1)

    x = jnp.broadcast_to(jnp.arange(128, dtype=jnp.float32), (8, 128))
    r = pl.pallas_call(
        probe,
        out_shape=jax.ShapeDtypeStruct((8, 128), jnp.float32),
        in_specs=[pl.BlockSpec(memory_space=pltpu.MemorySpace.VMEM)],
        out_specs=pl.BlockSpec(memory_space=pltpu.MemorySpace.VMEM),
    )(x)
    # np.roll convention => element 0 becomes the old last element (127).
    return -1 if int(r[0, 0]) == 127 else 1


# ----------------------------------------------------------------------------
# Fused Generator kernel: linear -> conv1+ReLU -> conv2+Sigmoid, one call.
# All work is batched; output is (B, FLAT) lane-dense.
# ----------------------------------------------------------------------------
def _generator_kernel(x_ref, lw_ref, lb_ref, w1_ref, b1_ref, w2_ref, b2_ref,
                      masks_ref, o_ref, *, shifts):
    # linear: (B, LATENT) @ (LATENT, FLAT) + bias -> y (B, FLAT)        [MXU]
    y = (jnp.dot(x_ref[...], lw_ref[...], preferred_element_type=jnp.float32)
         + lb_ref[...])

    masks = masks_ref[...]                 # (9, FLAT)
    w1 = w1_ref[...]                       # (C_HID, 9)
    w2 = w2_ref[...]                       # (C_HID, 9)
    b1 = b1_ref[...][None, :, :]           # (1, C_HID, 1)
    b2 = b2_ref[...]                       # (1, 1)

    # Hoisted per-tap constants (sliced once, reused in both convs).
    mrows = [masks[k:k + 1, :] for k in range(N_TAPS)]             # (1, FLAT)
    w1cols = [w1[:, k:k + 1][None, :, :] for k in range(N_TAPS)]   # (1,C_HID,1)
    w2cols = [w2[:, k:k + 1][None, :, :] for k in range(N_TAPS)]   # (1,C_HID,1)

    def tap(v, k):
        # v: (rows, FLAT) lane-dense; returns the zero-padded 3x3 stencil tap:
        #   tap[.., p] = v[.., p + DELTAS[k]]  if the source pixel is in-image,
        #                0                     otherwise.
        s = shifts[k]
        r = v if s == 0 else pltpu.roll(v, s, 1)      # XLU lane rotation
        return r * mrows[k]

    # conv1 (1 -> C_HID) + ReLU, whole batch at once: 9 masked lane rolls of
    # (B, FLAT) + 9 broadcast FMAs into (B, C_HID, FLAT).               [VPU]
    acc1 = tap(y, 0)[:, None, :] * w1cols[0]
    for k in range(1, N_TAPS):
        acc1 = acc1 + tap(y, k)[:, None, :] * w1cols[k]
    h = jnp.maximum(acc1 + b1, 0.0)                   # (B, C_HID, FLAT)

    # conv2 (C_HID -> 1) + Sigmoid: contract channels first (per-tap weighted
    # sublane reduce), then one 2-D masked lane roll per tap.      [VPU + XLU]
    out = tap(jnp.sum(h * w2cols[0], axis=1), 0)
    for k in range(1, N_TAPS):
        out = out + tap(jnp.sum(h * w2cols[k], axis=1), k)
    o_ref[...] = jax.nn.sigmoid(out + b2)             # (B, FLAT)       [EUP]


def generator_forward(p, x, *, shifts):
    bsz = x.shape[0]
    vmem = pl.BlockSpec(memory_space=pltpu.MemorySpace.VMEM)
    out = pl.pallas_call(
        functools.partial(_generator_kernel, shifts=shifts),
        out_shape=jax.ShapeDtypeStruct((bsz, FLAT), jnp.float32),
        in_specs=[vmem] * 8,
        out_specs=vmem,
    )(x, p["lin_w"], p["lin_b"], p["w1"], p["b1"], p["w2"], p["b2"], p["masks"])
    # un-pad the lane dimension and restore NCHW in the wrapper (layout only)
    return out[:, :HW].reshape(bsz, 1, H, W)


# ----------------------------------------------------------------------------
# Parameter handling
# ----------------------------------------------------------------------------
def prepare_params(params):
    """One-time re-layout of the PyTorch-style parameters for the kernel."""
    lw = jnp.zeros((LATENT, FLAT), jnp.float32).at[:, :HW].set(params["lin_w"])
    lb = jnp.zeros((1, FLAT), jnp.float32).at[:, :HW].set(params["lin_b"][None, :])
    w1 = params["conv1_w"].reshape(C_HID, N_TAPS)     # [co, ki*3+kj]
    b1 = params["conv1_b"].reshape(C_HID, 1)
    w2 = params["conv2_w"].reshape(C_HID, N_TAPS)     # [ci, ki*3+kj]
    b2 = params["conv2_b"].reshape(1, 1)
    masks = jnp.asarray(TAP_MASKS, dtype=jnp.float32)  # (9, FLAT)
    return dict(lin_w=lw, lin_b=lb, w1=w1, b1=b1, w2=w2, b2=b2, masks=masks)


def init_params(key):
    ks = jax.random.split(key, 6)

    def unif(k, shape, fan_in):
        bound = 1.0 / jnp.sqrt(fan_in)
        return jax.random.uniform(k, shape, jnp.float32, -bound, bound)

    n_out = 1 * H * W  # 576
    return {
        "lin_w": unif(ks[0], (LATENT, n_out), LATENT),     # stored (K, N)
        "lin_b": unif(ks[1], (n_out,), LATENT),
        "conv1_w": unif(ks[2], (C_HID, 1, 3, 3), 1 * 9),
        "conv1_b": unif(ks[3], (C_HID,), 1 * 9),
        "conv2_w": unif(ks[4], (1, C_HID, 3, 3), C_HID * 9),
        "conv2_b": unif(ks[5], (1,), C_HID * 9),
    }


# Pure-JAX reference (XLA) for correctness checking.
def reference_forward(params, x):
    y = x @ params["lin_w"] + params["lin_b"]
    y = y.reshape(-1, 1, H, W)
    dn = ("NCHW", "OIHW", "NCHW")
    h = lax.conv_general_dilated(y, params["conv1_w"], (1, 1), "SAME",
                                 dimension_numbers=dn)
    h = jnp.maximum(h + params["conv1_b"].reshape(1, -1, 1, 1), 0.0)
    o = lax.conv_general_dilated(h, params["conv2_w"], (1, 1), "SAME",
                                 dimension_numbers=dn)
    return jax.nn.sigmoid(o + params["conv2_b"].reshape(1, -1, 1, 1))


if __name__ == "__main__":
    key = jax.random.PRNGKey(0)
    k_params, k_x = jax.random.split(key)
    params = init_params(k_params)
    x = jax.random.normal(k_x, (B, LATENT), dtype=jnp.float32)

    prepped = prepare_params(params)
    sign = _detect_roll_sign()
    shifts = tuple(int((sign * d) % FLAT) for d in DELTAS)

    fwd = jax.jit(functools.partial(generator_forward, shifts=shifts))
    out = jax.block_until_ready(fwd(prepped, x))
    ref = jax.block_until_ready(reference_forward(params, x))

    assert out.shape == (B, 1, H, W), out.shape
    assert out.dtype == jnp.float32
    assert bool(jnp.all(jnp.isfinite(out)))
    assert bool(jnp.all((out >= 0.0) & (out <= 1.0)))   # sigmoid range
    np.testing.assert_allclose(np.asarray(out), np.asarray(ref),
                               atol=5e-3, rtol=5e-3)
    print("KERNEL_OK")
</pallas_src>

<mosaic_0001>
module attributes {stable_mosaic.version = 11 : i64} {
  func.func @probe(%arg0: memref<8x128xf32, #tpu.memory_space<vmem>>, %arg1: memref<8x128xf32, #tpu.memory_space<vmem>>) attributes {dimension_semantics = [], scalar_prefetch = 0 : i64, scratch_operands = 0 : i64, tpu.core_type = #tpu.core_type<tc>} {
    %c0 = arith.constant 0 : index
    %c0_0 = arith.constant 0 : index
    %0 = vector.load %arg0[%c0, %c0_0] : memref<8x128xf32, #tpu.memory_space<vmem>>, vector<8x128xf32>
    %c1_i32 = arith.constant 1 : i32
    %1 = tpu.dynamic_rotate %0 by %c1_i32 dim 1 : vector<8x128xf32>, i32 -> vector<8x128xf32>
    %c0_1 = arith.constant 0 : index
    %c0_2 = arith.constant 0 : index
    %2 = vector.load %arg1[%c0_1, %c0_2] : memref<8x128xf32, #tpu.memory_space<vmem>>, vector<8x128xf32>
    tpu.vector_store %arg1[%c0_1, %c0_2], %1 {strides = array<i32>} : memref<8x128xf32, #tpu.memory_space<vmem>>, vector<8x128xf32>,
    return
  }
}

</mosaic_0001>

<bundles_post_ra>
// kernel: tpu_custom_call.1
= control target key start
LH: loop header
LB: loop body
LE: loop exit
PB: predicated region body
PF: predicated region fallthrough
CT: control target
= control target key end

     0   :  { %6 = vsyncpa [#allocation3], 0  ;;  %s128_s0 = inlined_call_operand.hbm [shape: f32[8,128], index: 0, kind: input, shape index: {}]   ;;  %s129_s1 = inlined_call_operand.hbm [shape: f32[8,128], index: 1, kind: output, shape index: {}]  }
   0x1   :  { %7 = vsyncpa [#allocation4], 0  ;;  %s91_s6 = smov [#allocation2]   ;;  %s43_s10 = scalar_lea.hbm %s128_s0, 128 }
   0x2   :  { %s14_s7 = sshll.u32 %s91_s6, 4  ;;  %p44_p0 = scmp.ne.s32.totalorder %s128_s0, %s43_s10  ;;  %s15_s7 = int_to_ptr.vmem [resolvable:$true] %s14_s7 }
   0x3   :  { %p47_p1 = scmp.lt.u32.totalorder %s43_s10, %s128_s0 }
   0x5   :  { %p49_p2 = pnand %p47_p1, %p44_p0 }
   0x7   :  { %52 = shalt.err (!%p49_p2)
}
   0x8   :  { %s53_s15 = scalar_lea.vmem %s15_s7, 128  ;;  %p58_p4 = scmp.lt.s32.totalorder %s15_s7, %s15_s7 }
   0x9   :  { %p54_p3 = scmp.ne.s32.totalorder %s15_s7, %s53_s15  ;;  %p59_p5 = scmp.lt.s32.totalorder %s53_s15, %s53_s15 }
   0xb   :  { %p60_p6 = por %p59_p5, %p58_p4 }
   0xd   :  { %p61_p7 = pnand %p60_p6, %p54_p3 }
   0xf   :  { %64 = shalt.err (!%p61_p7)
}
  0x10   :  { %17 = dma.hbm_to_vmem [thread:$0]  %s128_s0, 128, %s15_s7, [#allocation3]  }
  0x11   :  { %87 = dma.done.wait [#allocation3], 128  }
  0x12   :  { %88 = vsyncadd [#allocation3], 4294967168  ;;  %v21_v0 = vld [vmem:[#allocation2] sm:$0xff]  ;;  %s92_s18 = smov 1   ;;  %s93_s19 = smov [#allocation5]  }
  0x13   :  { %22 = vrot.lane.b32.xlu0 %v21_v0, %s92_s18  ;;  %s31_s20 = sshll.u32 %s93_s19, 4  ;;  %s32_s20 = int_to_ptr.vmem [resolvable:$true] %s31_s20 }
  0x14   :  { %s65_s21 = scalar_lea.vmem %s32_s20, 128  ;;  %p70_p9 = scmp.lt.s32.totalorder %s32_s20, %s32_s20 }
  0x15   :  { %p66_p8 = scmp.ne.s32.totalorder %s32_s20, %s65_s21  ;;  %p71_p10 = scmp.lt.s32.totalorder %s65_s21, %s65_s21 }
  0x17   :  { %p72_p11 = por %p71_p10, %p70_p9 }
  0x19   :  { %p73_p12 = pnand %p72_p11, %p66_p8 }
  0x85   :  { %v23_v1 = vpop.permute.xlu0 %22 }
  0x86   :  { %24 = vst [vmem:[#allocation5] sm:$0xff] %v23_v1 }
  0x87   :  { %76 = shalt.err (!%p73_p12)
}
  0x88   :  { %s77_s0 = scalar_lea.hbm %s129_s1, 128 }
  0x89   :  { %p78_p13 = scmp.ne.s32.totalorder %s129_s1, %s77_s0  ;;  %p81_p0 = scmp.lt.u32.totalorder %s77_s0, %s129_s1 }
  0x8b   :  { %p83_p1 = pnand %p81_p0, %p78_p13 }
  0x8d   :  { %86 = shalt.err (!%p83_p1)
}
  0x8e   :  { %34 = dma.vmem_to_hbm [thread:$0]  %s32_s20, 128, %s129_s1, [#allocation4]  }
  0x8f   :  { %89 = dma.done.wait [#allocation4], 128  }
  0x90   :  { %90 = vsyncadd [#allocation4], 4294967168 }
  0x91   :  { %38 = vsyncpa [#allocation3], 1 }
  0x92   :  { %39 = vsyncpa [#allocation4], 1 }

</bundles_post_ra>
